<compile_context>
chip_gen: v7x
topology: tpu7x:2x2x1
jax: 0.10.0
libtpu: 0.0.40
codegen_flags: <defaults>
</compile_context>

<pallas_src>
import functools

import jax
import jax.numpy as jnp
from jax.experimental import pallas as pl
from jax.experimental.pallas import tpu as pltpu


def _round_up(x, m):
    return ((x + m - 1) // m) * m


def _lra_reduce_kernel(x_ref, w_ref, b_ref, vtz_ref, usum_ref, vsum_ref,
                       *, k_pad, n_valid, tile_n):
    """Pass 1: accumulate vt_z = V^T Z, colsum(U), colsum(V) over row tiles."""
    j = pl.program_id(0)

    @pl.when(j == 0)
    def _():
        vtz_ref[...] = jnp.zeros_like(vtz_ref)
        usum_ref[...] = jnp.zeros_like(usum_ref)
        vsum_ref[...] = jnp.zeros_like(vsum_ref)

    # Big matmul on the MXU: bf16 operands, f32 accumulate; elementwise in f32.
    tmp = jnp.dot(x_ref[...], w_ref[...], preferred_element_type=jnp.float32)
    tmp = jnp.maximum(tmp + b_ref[...], 0.0)          # (tile_n, 4*k_pad) f32

    # Mask rows that are N-padding (zero-padded X rows still give ReLU(b) != 0).
    row = jax.lax.broadcasted_iota(jnp.int32, (tile_n, 1), 0) + j * tile_n
    tmp = jnp.where(row < n_valid, tmp, 0.0)

    u = tmp[:, 0 * k_pad:1 * k_pad]
    v = tmp[:, 1 * k_pad:2 * k_pad]
    z = tmp[:, 2 * k_pad:3 * k_pad]

    # V^T @ Z without materializing a transpose: contract over the row axis.
    vtz_ref[...] += jax.lax.dot_general(
        v, z, dimension_numbers=(((0,), (0,)), ((), ())),
        preferred_element_type=jnp.float32)
    usum_ref[...] += jnp.sum(u, axis=0, keepdims=True)
    vsum_ref[...] += jnp.sum(v, axis=0, keepdims=True)


def _lra_output_kernel(x_ref, w_ref, b_ref, vtz_ref, usum_ref, vsum_ref, o_ref,
                       *, k_pad, n_valid):
    """Pass 2: o_tile = [ U @ vt_z * D || T ] with lane-dense 128-aligned stores."""
    tmp = jnp.dot(x_ref[...], w_ref[...], preferred_element_type=jnp.float32)
    tmp = jnp.maximum(tmp + b_ref[...], 0.0)

    u = tmp[:, 0 * k_pad:1 * k_pad]
    t = tmp[:, 3 * k_pad:4 * k_pad]

    # norm = dot(colsum(U), colsum(V)) / N + 1e-6 ;  D = 1/norm   (all f32)
    norm = jnp.sum(usum_ref[...] * vsum_ref[...], axis=1, keepdims=True)
    norm = norm / n_valid + 1e-6                      # (1, 1)
    d_scale = pl.reciprocal(norm, approx=False)       # exact; approx=True -> EUP

    # Small second-stage matmul kept in f32 for accuracy.
    res = jnp.dot(u, vtz_ref[...], preferred_element_type=jnp.float32)

    # Two direct slice-writes (no concatenated temporary), each 128-lane aligned.
    o_ref[:, 0:k_pad] = (res * d_scale).astype(o_ref.dtype)
    o_ref[:, k_pad:2 * k_pad] = t.astype(o_ref.dtype)


def low_rank_attention(x, w, b, *, tile_n=512, matmul_dtype=jnp.bfloat16):
    """x: (N, d); w: (d, 4k) pre-transposed Linear weight; b: (4k,) -> (N, 2k) f32."""
    n, d = x.shape
    four_k = w.shape[1]
    k = four_k // 4
    assert w.shape == (d, 4 * k) and b.shape == (four_k,)

    # Lane-align each of the U/V/Z/T column groups to 128 lanes.  Zero padding is
    # exact: padded columns stay 0 through ReLU and all downstream reductions.
    k_pad = _round_up(k, 128)
    w_pad = jnp.zeros((d, 4 * k_pad), dtype=matmul_dtype)
    b_pad = jnp.zeros((1, 4 * k_pad), dtype=jnp.float32)
    for p in range(4):
        w_pad = w_pad.at[:, p * k_pad:p * k_pad + k].set(
            w[:, p * k:(p + 1) * k].astype(matmul_dtype))
        b_pad = b_pad.at[:, p * k_pad:p * k_pad + k].set(
            b[p * k:(p + 1) * k].astype(jnp.float32))

    # Row tiling (double-buffered by BlockSpec pipelining).
    tile_n = max(8, min(_round_up(tile_n, 8), _round_up(n, 8)))
    n_pad = _round_up(n, tile_n)
    x_m = x.astype(matmul_dtype)
    if n_pad != n:
        x_m = jnp.pad(x_m, ((0, n_pad - n), (0, 0)))
    n_tiles = n_pad // tile_n

    cparams_reduce = pltpu.CompilerParams(
        dimension_semantics=("arbitrary",),            # reduction over row tiles
        vmem_limit_bytes=32 * 1024 * 1024)             # v7x-safe scoped budget
    cparams_out = pltpu.CompilerParams(
        dimension_semantics=("parallel",),             # row tiles split across TCs
        vmem_limit_bytes=32 * 1024 * 1024)

    # ---- Pass 1: accumulate vt_z (k_pad,k_pad), colsum(U), colsum(V) ----
    vtz, u_sum, v_sum = pl.pallas_call(
        functools.partial(_lra_reduce_kernel,
                          k_pad=k_pad, n_valid=n, tile_n=tile_n),
        out_shape=(
            jax.ShapeDtypeStruct((k_pad, k_pad), jnp.float32),
            jax.ShapeDtypeStruct((1, k_pad), jnp.float32),
            jax.ShapeDtypeStruct((1, k_pad), jnp.float32),
        ),
        grid_spec=pltpu.PrefetchScalarGridSpec(
            num_scalar_prefetch=0,
            grid=(n_tiles,),
            in_specs=[
                pl.BlockSpec((tile_n, d), lambda j: (j, 0)),
                pl.BlockSpec((d, 4 * k_pad), lambda j: (0, 0)),
                pl.BlockSpec((1, 4 * k_pad), lambda j: (0, 0)),
            ],
            out_specs=(
                pl.BlockSpec((k_pad, k_pad), lambda j: (0, 0)),
                pl.BlockSpec((1, k_pad), lambda j: (0, 0)),
                pl.BlockSpec((1, k_pad), lambda j: (0, 0)),
            )),
        compiler_params=cparams_reduce,
    )(x_m, w_pad, b_pad)

    # ---- Pass 2: stream row tiles again, emit lane-dense padded output ----
    out_pad = pl.pallas_call(
        functools.partial(_lra_output_kernel, k_pad=k_pad, n_valid=n),
        out_shape=jax.ShapeDtypeStruct((n_pad, 2 * k_pad), jnp.float32),
        grid_spec=pltpu.PrefetchScalarGridSpec(
            num_scalar_prefetch=0,
            grid=(n_tiles,),
            in_specs=[
                pl.BlockSpec((tile_n, d), lambda j: (j, 0)),
                pl.BlockSpec((d, 4 * k_pad), lambda j: (0, 0)),
                pl.BlockSpec((1, 4 * k_pad), lambda j: (0, 0)),
                pl.BlockSpec((k_pad, k_pad), lambda j: (0, 0)),
                pl.BlockSpec((1, k_pad), lambda j: (0, 0)),
                pl.BlockSpec((1, k_pad), lambda j: (0, 0)),
            ],
            out_specs=pl.BlockSpec((tile_n, 2 * k_pad), lambda j: (j, 0))),
        compiler_params=cparams_out,
    )(x_m, w_pad, b_pad, vtz, u_sum, v_sum)

    # Strip row/lane padding and assemble the (N, 2k) output [res*D || T].
    return jnp.concatenate(
        [out_pad[:n, :k], out_pad[:n, k_pad:k_pad + k]], axis=1)


def _reference(x, w, b, matmul_dtype=jnp.float32):
    """Pure-JAX reference mirroring the PyTorch forward (eval mode)."""
    n = x.shape[0]
    k = w.shape[1] // 4
    tmp = jnp.dot(x.astype(matmul_dtype), w.astype(matmul_dtype),
                  preferred_element_type=jnp.float32)
    tmp = jnp.maximum(tmp + b[None, :].astype(jnp.float32), 0.0)
    U, V, Z, T = tmp[:, :k], tmp[:, k:2 * k], tmp[:, 2 * k:3 * k], tmp[:, 3 * k:]
    ones = jnp.ones((n, 1), jnp.float32)
    norm = jnp.sum(U @ (V.T @ ones)) / n + 1e-6
    D = 1.0 / norm
    res = U @ (V.T @ Z)
    return jnp.concatenate([res * D, T], axis=1)


if __name__ == "__main__":
    # Small shapes consistent with the module: N tokens/nodes, embedding d, rank k.
    N, d, k = 24, 32, 8
    key = jax.random.PRNGKey(0)
    kx, kw, kb = jax.random.split(key, 3)

    x = jax.random.normal(kx, (N, d), dtype=jnp.float32)

    # Xavier-normal weight for Linear(d, 4k), stored pre-transposed as (d, 4k).
    std = (2.0 / (d + 4 * k)) ** 0.5
    w = std * jax.random.normal(kw, (d, 4 * k), dtype=jnp.float32)
    # Module init uses zero bias; a small non-zero bias also exercises the
    # row-padding mask in the reduction pass (forward semantics are unchanged).
    b = 0.1 * jax.random.normal(kb, (4 * k,), dtype=jnp.float32)

    # tile_n=16 forces a 2-tile grid with a partially masked last tile.
    out = low_rank_attention(x, w, b, tile_n=16)
    out = jax.block_until_ready(out)
    assert out.shape == (N, 2 * k)

    # Check against a reference applying the same bf16 rounding on the big matmul.
    ref_bf16 = _reference(x, w, b, matmul_dtype=jnp.bfloat16)
    assert jnp.allclose(out, ref_bf16, atol=5e-3, rtol=5e-3)

    # Loose check against the exact f32 module semantics.
    ref_f32 = _reference(x, w, b, matmul_dtype=jnp.float32)
    assert jnp.allclose(out, ref_f32, atol=3e-2, rtol=3e-2)

    print("KERNEL_OK")
</pallas_src>

<mosaic_0001>
module attributes {stable_mosaic.version = 11 : i64} {
  func.func @_lra_reduce_kernel(%arg0: i32, %arg1: memref<16x32xbf16, #tpu.memory_space<vmem>>, %arg2: memref<32x512xbf16, #tpu.memory_space<vmem>>, %arg3: memref<1x512xf32, #tpu.memory_space<vmem>>, %arg4: memref<128x128xf32, #tpu.memory_space<vmem>>, %arg5: memref<1x128xf32, #tpu.memory_space<vmem>>, %arg6: memref<1x128xf32, #tpu.memory_space<vmem>>) attributes {dimension_semantics = [#tpu.dimension_semantics<arbitrary>], iteration_bounds = array<i64: 2>, scalar_prefetch = 0 : i64, scratch_operands = 0 : i64, tpu.core_type = #tpu.core_type<tc>, window_params = [{transform_indices = @transform_0, window_bounds = array<i64: 16, 32>}, {pipeline_mode = #tpu.pipeline_mode<synchronous>, transform_indices = @transform_1, window_bounds = array<i64: 32, 512>}, {pipeline_mode = #tpu.pipeline_mode<synchronous>, transform_indices = @transform_2, window_bounds = array<i64: 1, 512>}, {pipeline_mode = #tpu.pipeline_mode<synchronous>, transform_indices = @transform_3, window_bounds = array<i64: 128, 128>}, {pipeline_mode = #tpu.pipeline_mode<synchronous>, transform_indices = @transform_4, window_bounds = array<i64: 1, 128>}, {pipeline_mode = #tpu.pipeline_mode<synchronous>, transform_indices = @transform_5, window_bounds = array<i64: 1, 128>}]} {
    %c0_i32 = arith.constant 0 : i32
    %0 = arith.cmpi eq, %arg0, %c0_i32 : i32
    %1 = arith.extui %0 : i1 to i32
    %c0_i32_0 = arith.constant 0 : i32
    %2 = arith.cmpi ne, %1, %c0_i32_0 : i32
    scf.if %2 {
      %cst_23 = arith.constant 0.000000e+00 : f32
      %38 = vector.broadcast %cst_23 : f32 to vector<128x128xf32>
      %c0_24 = arith.constant 0 : index
      %c0_25 = arith.constant 0 : index
      %39 = vector.load %arg4[%c0_24, %c0_25] : memref<128x128xf32, #tpu.memory_space<vmem>>, vector<128x128xf32>
      tpu.vector_store %arg4[%c0_24, %c0_25], %38 {strides = array<i32>} : memref<128x128xf32, #tpu.memory_space<vmem>>, vector<128x128xf32>,
      %cst_26 = arith.constant 0.000000e+00 : f32
      %40 = vector.broadcast %cst_26 : f32 to vector<1x128xf32>
      %c0_27 = arith.constant 0 : index
      %c0_28 = arith.constant 0 : index
      %41 = vector.load %arg5[%c0_27, %c0_28] : memref<1x128xf32, #tpu.memory_space<vmem>>, vector<1x128xf32>
      tpu.vector_store %arg5[%c0_27, %c0_28], %40 {strides = array<i32>} : memref<1x128xf32, #tpu.memory_space<vmem>>, vector<1x128xf32>,
      %cst_29 = arith.constant 0.000000e+00 : f32
      %42 = vector.broadcast %cst_29 : f32 to vector<1x128xf32>
      %c0_30 = arith.constant 0 : index
      %c0_31 = arith.constant 0 : index
      %43 = vector.load %arg6[%c0_30, %c0_31] : memref<1x128xf32, #tpu.memory_space<vmem>>, vector<1x128xf32>
      tpu.vector_store %arg6[%c0_30, %c0_31], %42 {strides = array<i32>} : memref<1x128xf32, #tpu.memory_space<vmem>>, vector<1x128xf32>,
    } else {
    }
    %c0 = arith.constant 0 : index
    %c0_1 = arith.constant 0 : index
    %3 = vector.load %arg1[%c0, %c0_1] : memref<16x32xbf16, #tpu.memory_space<vmem>>, vector<16x32xbf16>
    %c0_2 = arith.constant 0 : index
    %c0_3 = arith.constant 0 : index
    %4 = vector.load %arg2[%c0_2, %c0_3] : memref<32x512xbf16, #tpu.memory_space<vmem>>, vector<32x512xbf16>
    %cst = arith.constant dense<0.000000e+00> : vector<16x512xf32>
    %5 = tpu.matmul %3, %4, %cst {dimension_numbers = #tpu.dot_dimension_numbers<[1], [0], [0], [1], [0, 0, 1, 1], [], []>} : vector<16x32xbf16>, vector<32x512xbf16>, vector<16x512xf32> -> vector<16x512xf32>
    %c0_4 = arith.constant 0 : index
    %c0_5 = arith.constant 0 : index
    %6 = vector.load %arg3[%c0_4, %c0_5] : memref<1x512xf32, #tpu.memory_space<vmem>>, vector<1x512xf32>
    %7 = vector.broadcast %6 : vector<1x512xf32> to vector<16x512xf32>
    %8 = arith.addf %5, %7 : vector<16x512xf32>
    %cst_6 = arith.constant 0.000000e+00 : f32
    %9 = vector.broadcast %cst_6 : f32 to vector<16x512xf32>
    %10 = arith.maximumf %8, %9 : vector<16x512xf32>
    %11 = tpu.iota {dimensions = array<i32: 0>} : vector<16x1xi32>
    %c16_i32 = arith.constant 16 : i32
    %12 = arith.muli %arg0, %c16_i32 : i32
    %13 = vector.broadcast %12 : i32 to vector<16x1xi32>
    %14 = arith.addi %11, %13 : vector<16x1xi32>
    %c24_i32 = arith.constant 24 : i32
    %15 = vector.broadcast %c24_i32 : i32 to vector<16x1xi32>
    %16 = arith.cmpi slt, %14, %15 : vector<16x1xi32>
    %cst_7 = arith.constant 0.000000e+00 : f32
    %17 = vector.shape_cast %16 : vector<16x1xi1> to vector<16x1xi1>
    %18 = vector.broadcast %17 : vector<16x1xi1> to vector<16x512xi1>
    %19 = vector.broadcast %cst_7 : f32 to vector<16x512xf32>
    %20 = arith.select %18, %10, %19 : vector<16x512xi1>, vector<16x512xf32>
    %21 = vector.extract_strided_slice %20 {offsets = [0, 0], sizes = [16, 128], strides = [1, 1]} : vector<16x512xf32> to vector<16x128xf32>
    %22 = vector.extract_strided_slice %20 {offsets = [0, 128], sizes = [16, 128], strides = [1, 1]} : vector<16x512xf32> to vector<16x128xf32>
    %23 = vector.extract_strided_slice %20 {offsets = [0, 256], sizes = [16, 128], strides = [1, 1]} : vector<16x512xf32> to vector<16x128xf32>
    %c0_8 = arith.constant 0 : index
    %c0_9 = arith.constant 0 : index
    %24 = vector.load %arg4[%c0_8, %c0_9] : memref<128x128xf32, #tpu.memory_space<vmem>>, vector<128x128xf32>
    %cst_10 = arith.constant dense<0.000000e+00> : vector<128x128xf32>
    %25 = tpu.matmul %22, %23, %cst_10 {dimension_numbers = #tpu.dot_dimension_numbers<[0], [0], [1], [1], [0, 1, 1, 1], [], []>} : vector<16x128xf32>, vector<16x128xf32>, vector<128x128xf32> -> vector<128x128xf32>
    %26 = arith.addf %24, %25 : vector<128x128xf32>
    %c0_11 = arith.constant 0 : index
    %c0_12 = arith.constant 0 : index
    %27 = vector.load %arg4[%c0_11, %c0_12] : memref<128x128xf32, #tpu.memory_space<vmem>>, vector<128x128xf32>
    tpu.vector_store %arg4[%c0_11, %c0_12], %26 {strides = array<i32>} : memref<128x128xf32, #tpu.memory_space<vmem>>, vector<128x128xf32>,
    %c0_13 = arith.constant 0 : index
    %c0_14 = arith.constant 0 : index
    %28 = vector.load %arg5[%c0_13, %c0_14] : memref<1x128xf32, #tpu.memory_space<vmem>>, vector<1x128xf32>
    %cst_15 = arith.constant dense<0.000000e+00> : vector<128xf32>
    %29 = vector.multi_reduction <add>, %21, %cst_15 [0] : vector<16x128xf32> to vector<128xf32>
    %30 = vector.shape_cast %29 : vector<128xf32> to vector<1x128xf32>
    %31 = arith.addf %28, %30 : vector<1x128xf32>
    %c0_16 = arith.constant 0 : index
    %c0_17 = arith.constant 0 : index
    %32 = vector.load %arg5[%c0_16, %c0_17] : memref<1x128xf32, #tpu.memory_space<vmem>>, vector<1x128xf32>
    tpu.vector_store %arg5[%c0_16, %c0_17], %31 {strides = array<i32>} : memref<1x128xf32, #tpu.memory_space<vmem>>, vector<1x128xf32>,
    %c0_18 = arith.constant 0 : index
    %c0_19 = arith.constant 0 : index
    %33 = vector.load %arg6[%c0_18, %c0_19] : memref<1x128xf32, #tpu.memory_space<vmem>>, vector<1x128xf32>
    %cst_20 = arith.constant dense<0.000000e+00> : vector<128xf32>
    %34 = vector.multi_reduction <add>, %22, %cst_20 [0] : vector<16x128xf32> to vector<128xf32>
    %35 = vector.shape_cast %34 : vector<128xf32> to vector<1x128xf32>
    %36 = arith.addf %33, %35 : vector<1x128xf32>
    %c0_21 = arith.constant 0 : index
    %c0_22 = arith.constant 0 : index
    %37 = vector.load %arg6[%c0_21, %c0_22] : memref<1x128xf32, #tpu.memory_space<vmem>>, vector<1x128xf32>
    tpu.vector_store %arg6[%c0_21, %c0_22], %36 {strides = array<i32>} : memref<1x128xf32, #tpu.memory_space<vmem>>, vector<1x128xf32>,
    return
  }
  func.func @transform_0(%arg0: i32) -> (i32, i32) {
    %c0_i32 = arith.constant 0 : i32
    %c0_i32_0 = arith.constant 0 : i32
    return %arg0, %c0_i32 : i32, i32
  }
  func.func @transform_1(%arg0: i32) -> (i32, i32) {
    %c0_i32 = arith.constant 0 : i32
    %c0_i32_0 = arith.constant 0 : i32
    %c0_i32_1 = arith.constant 0 : i32
    return %c0_i32, %c0_i32_0 : i32, i32
  }
  func.func @transform_2(%arg0: i32) -> (i32, i32) {
    %c0_i32 = arith.constant 0 : i32
    %c0_i32_0 = arith.constant 0 : i32
    %c0_i32_1 = arith.constant 0 : i32
    return %c0_i32, %c0_i32_0 : i32, i32
  }
  func.func @transform_3(%arg0: i32) -> (i32, i32) {
    %c0_i32 = arith.constant 0 : i32
    %c0_i32_0 = arith.constant 0 : i32
    %c0_i32_1 = arith.constant 0 : i32
    return %c0_i32, %c0_i32_0 : i32, i32
  }
  func.func @transform_4(%arg0: i32) -> (i32, i32) {
    %c0_i32 = arith.constant 0 : i32
    %c0_i32_0 = arith.constant 0 : i32
    %c0_i32_1 = arith.constant 0 : i32
    return %c0_i32, %c0_i32_0 : i32, i32
  }
  func.func @transform_5(%arg0: i32) -> (i32, i32) {
    %c0_i32 = arith.constant 0 : i32
    %c0_i32_0 = arith.constant 0 : i32
    %c0_i32_1 = arith.constant 0 : i32
    return %c0_i32, %c0_i32_0 : i32, i32
  }
}

</mosaic_0001>

<bundles_post_ra>
// kernel: tpu_custom_call.1
= control target key start
LH: loop header
LB: loop body
LE: loop exit
PB: predicated region body
PF: predicated region fallthrough
CT: control target
= control target key end

     0   :  { %11 = vsyncpa [#allocation3], 0  ;;  %s1515_s0 = inlined_call_operand.hbm [shape: bf16[32,32], index: 0, kind: input, shape index: {}]   ;;  %s1516_s1 = inlined_call_operand.hbm [shape: bf16[32,512], index: 1, kind: input, shape index: {}]   ;;  %s1517_s2 = inlined_call_operand.vmem [shape: f32[1,512], index: 2, kind: input, shape index: {}]   ;;  %s1518_s3 = inlined_call_operand.hbm [shape: f32[128,128], index: 3, kind: output, shape index: {0}]   ;;  %s1519_s4 = inlined_call_operand.hbm [shape: f32[1,128], index: 4, kind: output, shape index: {1}]   ;;  %s1520_s5 = inlined_call_operand.hbm [shape: f32[1,128], index: 5, kind: output, shape index: {2}]  }
   0x1   :  { %13 = vsyncpa [#allocation3 + $0x1], 0 }
   0x2   :  { %14 = vsyncpa [#allocation6], 0 }
   0x3   :  { %15 = vsyncpa [#allocation4], 0 }
   0x4   :  { %16 = vsyncpa [#allocation9], 0  ;;  %s1281_s18 = smov 0   ;;  %s1283_s19 = smov 0  }
   0x5   :  { %s1285_s20 = smov 0   ;;  %s1287_s21 = smov 0  }
   0x6 LB: > { %s1300_s22 = sadd.s32 4294967295, %s1236_s21   ;;  %p42_p0 = scmp.ne.s32.totalorder %s1228_s19, %s1224_s18  ;;  %s1236_s21 = sphi %s1287_s21, %s1537_s21   ;;  %s1232_s20 = sphi %s1285_s20, %s1536_s20   ;;  %s1228_s19 = sphi %s1283_s19, %s1535_s19   ;;  %s1224_s18 = sphi %s1281_s18, %s1534_s18  }
   0x7   : > { %p1521_p1 = scmp.eq.s32.totalorder %s1300_s22, 0  ;;  %p858_p2 = scmp.ge.s32.totalorder %s1236_s21, 1 }
   0x8   : > { %p158_p3 = scmp.lt.s32.totalorder %s1236_s21, 3  ;;  %s1238_s25 = smov [#allocation5]  }
   0x9   : > { %p1309_p5 = por %p1521_p1, %p42_p0  ;;  %s170_s26 = sshll.u32 %s1238_s25, 4  ;;  %s171_s26 = int_to_ptr.vmem [resolvable:$true] %s170_s26 }
   0xa   : > { %p1313_p6 = pnand %p858_p2, %p158_p3  ;;  %s1326_s28 = sadd.s32 1, %s1236_s21  }
   0xb   : > { %s1524_s23 = scalar_select %p1309_p5, 1, 0 }
   0xc   : > { %s1525_s24 = scalar_select %p1313_p6, 1, 0 }
   0xd   : > { %p979_p7 = pneg %p1313_p6  ;;  %s29_s29 = sadd.s32 1, %s1232_s20 }
   0xe   : > { %s26_s30 = ssub.s32 %s1236_s21, %s1326_s28  ;;  %s1054_s8 = scalar_lea.hbm %s1516_s1, 1024 }
   0xf   : > { %p1321_p8 = pnand %p979_p7, %p1521_p1  ;;  %p1055_p9 = scmp.ne.s32.totalorder %s1516_s1, %s1054_s8 }
  0x10   : > { %p1061_p13 = scmp.lt.u32.totalorder %s1054_s8, %s1516_s1 }
  0x11   : > { %p1056_p10 = pneg %p1321_p8 }
  0x13   : > { %p1057_p11 = pnand %p1056_p10, %p1055_p9 }
  0x15   : > { %p1058_p12 = pneg %p1057_p11 }
  0x17   : > { %p1063_p0 = pnand %p1061_p13, %p1058_p12 }
  0x19   : > { %1066 = shalt.err (!%p1063_p0)
}
  0x1a   : > { %s1067_s13 = scalar_lea.vmem %s171_s26, 1024  ;;  %p1075_p4 = scmp.lt.s32.totalorder %s171_s26, %s171_s26 }
  0x1b   : > { %p1068_p2 = scmp.ne.s32.totalorder %s171_s26, %s1067_s13  ;;  %p1076_p1 = scmp.lt.s32.totalorder %s1067_s13, %s1067_s13 }
  0x1d   : > { %p1070_p3 = pnand %p1068_p2, %p1056_p10  ;;  %p1077_p5 = por %p1076_p1, %p1075_p4 }
  0x1f   : > { %p1071_p7 = pneg %p1070_p3 }
  0x21   : > { %p1078_p6 = pnand %p1077_p5, %p1071_p7 }
  0x23   : > { %1081 = shalt.err (!%p1078_p6)
}
  0x24   : > { %s1239_s14 = smov 256   ;;  %s1240_s15 = smov 16  }
  0x25   : > { %982 = dma.hbm_to_vmem [thread:$0]  (!%p1321_p8), %s1516_s1, 1024, %s171_s26, [#allocation6], %s1239_s14, %s1239_s14, %s1240_s15  }
  0x26   : > { %p27_p9 = scmp.eq.s32.totalorder %s26_s30, 0  ;;  %p36_p10 = scmp.ne.s32.totalorder %s1232_s20, %s1228_s19 }
  0x27   : > { %p37_p1 = scmp.eq.s32.totalorder %s1236_s21, 0  ;;  %p988_p4 = scmp.lt.s32.totalorder %s1236_s21, 2 }
  0x28   : > { %s1352_s18 = scalar_select %p27_p9, %s1232_s20, %s29_s29  }
  0x29   : > { %p38_p5 = por %p37_p1, %p36_p10  ;;  %s187_s25 = sand.u32 1, %s1232_s20  }
  0x2a   : > { %s861_s6 = sshll.u32 %s187_s25, 3  ;;  %s906_s7 = sshll.u32 %s1236_s21, 7 }
  0x2b   : > { %s1359_s10 = scalar_lea.hbm %s1515_s0, %s906_s7  ;;  %s191_s26 = scalar_lea.vmem [#allocation2], %s861_s6 }
  0x2c   : > { %s198_s27 = sshll.u32 %s191_s26, 4  ;;  %p1363_p6 = pnand %p988_p4, %p38_p5  ;;  %s1361_s27 = int_to_ptr.vmem [resolvable:$true] %s198_s27 }
  0x2d   : > { %s1367_s21 = scalar_lea.sflag [#allocation3], %s187_s25  ;;  %s1082_s30 = scalar_lea.hbm %s1359_s10, 128 }
  0x2e   : > { %p1083_p8 = scmp.ne.s32.totalorder %s1359_s10, %s1082_s30  ;;  %p1084_p11 = pneg %p1363_p6 }
  0x2f   : > { %s1087_s13 = scalar_lea.hbm %s1515_s0, 256  ;;  %p1088_p0 = scmp.lt.u32.totalorder %s1359_s10, %s1515_s0 }
  0x30   : > { %p1085_p12 = pnand %p1084_p11, %p1083_p8  ;;  %p1089_p2 = scmp.lt.u32.totalorder %s1087_s13, %s1082_s30 }
  0x31   : > { %p1091_p7 = scmp.lt.u32.totalorder %s1082_s30, %s1359_s10 }
  0x32   : > { %p1086_p13 = pneg %p1085_p12  ;;  %p1090_p3 = por %p1089_p2, %p1088_p0 }
  0x34   : > { %p1092_p9 = por %p1091_p7, %p1090_p3 }
  0x36   : > { %p1093_p10 = pnand %p1092_p9, %p1086_p13 }
  0x38   : > { %1096 = shalt.err (!%p1093_p10)
}
  0x39   : > { %s1097_s16 = scalar_lea.vmem %s1361_s27, 128  ;;  %s1241_s17 = smov [#allocation2]  }
  0x3a   : > { %p1098_p1 = scmp.ne.s32.totalorder %s1361_s27, %s1097_s16  ;;  %s1102_s25 = sshll.u32 %s1241_s17, 4  ;;  %s1103_s25 = int_to_ptr.vmem [resolvable:$false] %s1102_s25 }
  0x3b   : > { %s1104_s6 = scalar_lea.vmem %s1103_s25, 256  ;;  %p1105_p8 = scmp.lt.s32.totalorder %s1361_s27, %s1103_s25 }
  0x3c   : > { %p1100_p4 = pnand %p1098_p1, %p1084_p11  ;;  %p1106_p12 = scmp.lt.s32.totalorder %s1104_s6, %s1097_s16 }
  0x3e   : > { %p1101_p5 = pneg %p1100_p4  ;;  %p1107_p0 = por %p1106_p12, %p1105_p8 }
  0x40   : > { %p1108_p2 = pnand %p1107_p0, %p1101_p5 }
  0x42   : > { %1111 = shalt.err (!%p1108_p2)
}
  0x43   : > { %s1242_s7 = smov 64   ;;  %s1243_s8 = smov 4  }
  0x44   : > { %986 = dma.hbm_to_vmem [thread:$0]  (!%p1363_p6), %s1359_s10, 128, %s1361_s27, %s1367_s21, %s1242_s7, %s1242_s7, %s1243_s8  }
  0x45   : > { %p1528_p11 = scmp.ne.s32.totalorder %s1525_s24, 0 }
  0x46   : > { %s212_s9 = sand.u32 (!%p1528_p11), 1, %s1228_s19   ;;  %p1529_p13 = scmp.ne.s32.totalorder (!%p1528_p11), %s1524_s23, 0 }
  0x47   : > { %210 = sbr.rel (%p1528_p11) target bundleno = 743 (0x2e7), region = 32  ;;  %s1398_s26 = sshll.u32 (!%p1528_p11), %s212_s9, 3 }
  0x48   : > { %s213_s30 = scalar_lea.sflag (!%p1528_p11), [#allocation3], %s212_s9  ;;  %s216_s11 = scalar_lea.vmem (!%p1528_p11), [#allocation2], %s1398_s26 }
  0x4e   : > { %1207 = dma.done.wait (%p1529_p13), %s213_s30, 128  }
  0x4f   : > { %1209 = vsyncadd (%p1529_p13), %s213_s30, 4294967168  ;;  %p1530_p3 = scmp.eq.s32.totalorder %s1300_s22, 0 }
  0x51   : > { %1211 = dma.done.wait (%p1530_p3), [#allocation6], 1024   ;;  %p1531_p6 = pmov %p1530_p3 }
  0x52   : > { %p1532_p7 = scmp.ne.s32.totalorder %s1300_s22, 0 }
  0x53   : > { %1213 = vsyncadd (%p1531_p6), [#allocation6], 4294966272  ;;  %v1244_v0 = vmov (!%p1532_p7), 0.0  }
  0x54   : > { %247 = sbr.rel (%p1532_p7) target bundleno = 93 (0x5d), region = 44  ;;  %248 = vst [vmem:[#allocation7] sm:$0xff] (!%p1532_p7), %v1244_v0  ;;  %249 = vst [vmem:[#allocation7 + $0x8] sm:$0xff] (!%p1532_p7), %v1244_v0 }
  0x55   : > { %250 = vst [vmem:[#allocation7 + $0x10] sm:$0xff] (!%p1532_p7), %v1244_v0  ;;  %251 = vst [vmem:[#allocation7 + $0x18] sm:$0xff] (!%p1532_p7), %v1244_v0 }
  0x56   : > { %252 = vst [vmem:[#allocation7 + $0x20] sm:$0xff] (!%p1532_p7), %v1244_v0  ;;  %253 = vst [vmem:[#allocation7 + $0x28] sm:$0xff] (!%p1532_p7), %v1244_v0 }
  0x57   : > { %254 = vst [vmem:[#allocation7 + $0x30] sm:$0xff] (!%p1532_p7), %v1244_v0  ;;  %255 = vst [vmem:[#allocation7 + $0x38] sm:$0xff] (!%p1532_p7), %v1244_v0 }
  0x58   : > { %256 = vst [vmem:[#allocation7 + $0x40] sm:$0xff] (!%p1532_p7), %v1244_v0  ;;  %257 = vst [vmem:[#allocation7 + $0x48] sm:$0xff] (!%p1532_p7), %v1244_v0 }
  0x59   : > { %258 = vst [vmem:[#allocation7 + $0x50] sm:$0xff] (!%p1532_p7), %v1244_v0  ;;  %259 = vst [vmem:[#allocation7 + $0x58] sm:$0xff] (!%p1532_p7), %v1244_v0 }
  0x5a   : > { %260 = vst [vmem:[#allocation7 + $0x60] sm:$0xff] (!%p1532_p7), %v1244_v0  ;;  %261 = vst [vmem:[#allocation7 + $0x68] sm:$0xff] (!%p1532_p7), %v1244_v0 }
  0x5b   : > { %262 = vst [vmem:[#allocation7 + $0x70] sm:$0xff] %v1244_v0  ;;  %263 = vst [vmem:[#allocation7 + $0x78] sm:$0xff] %v1244_v0 }
  0x5c   : > { %264 = vst [vmem:[#allocation8] sm:$0x1] %v1244_v0  ;;  %265 = vst [vmem:[#allocation10] sm:$0x1] %v1244_v0 }
  0x5d PF: > { %v1041_v1 = vld [vmem:[#allocation5 + $0x4] ss:$16 sps:$4 sm:$0xff]   ;;  %v1043_v2 = vld [vmem:[#allocation5] ss:$16 sps:$4 sm:$0xff]   ;;  %v1245_v3 = vmov 0   ;;  %vm338_vm0 = vcmask 261120   ;;  %v278_v11 = vlaneseq }
  0x5e   : > { %374 = vmatprep.mubr.bf16.mxu0 %v1245_v3  ;;  %417 = vmatprep.mubr.bf16.mxu1 %v1245_v3  ;;  %v1044_v4 = vld [vmem:[#allocation5 + $0x24] ss:$16 sps:$4 sm:$0xff]   ;;  %v1046_v5 = vld [vmem:[#allocation5 + $0x20] ss:$16 sps:$4 sm:$0xff]   ;;  %v1048_v6 = vld [vmem:[#allocation5 + $0xc] ss:$16 sps:$4 sm:$0xff]  }
  0x5f   : > { %342 = vmatprep.subr.bf16.mxu0 %v1041_v1  ;;  %v1050_v7 = vld [vmem:[#allocation5 + $0x8] ss:$16 sps:$4 sm:$0xff]   ;;  %v1051_v8 = vld [vmem:[#allocation5 + $0x2c] ss:$16 sps:$4 sm:$0xff]   ;;  %385 = vmatprep.subr.bf16.mxu1 %v1048_v6  ;;  %v279_v12 = vshrl.u32 %v278_v11, 7  ;;  %s879_s23 = sshll.u32 %s1300_s22, 4 }
  0x60   : > { %343 = vmatpush1.bf16.msra.mxu0 %v1043_v2  ;;  %v1047_v9 = vld [vmem:[%s216_s11] sm:$0xff]   ;;  %386 = vmatpush1.bf16.msra.mxu1 %v1050_v7  ;;  %v436_v16 = vstv %s879_s23  ;;  %vm499_vm4 = vcmask 130048   ;;  %p990_p9 = scmp.eq.s32.totalorder %s1300_s22, 1  ;;  %s1246_s27 = smov [#allocation8]  }
  0x61   : > { %344 = vmatprep.subr.bf16.mxu0 %v1044_v4  ;;  %v1053_v10 = vld [vmem:[#allocation5 + $0x28] ss:$16 sps:$4 sm:$0xff]   ;;  %387 = vmatprep.subr.bf16.mxu1 %v1051_v8  ;;  %v280_v13 = vsub.s32 0, %v279_v12  ;;  %v276_v14 = vld [vmem:[%s1517_s2] sm:$0xf]  ;;  %v284_v15 = vsub.s32 1, %v279_v12  ;;  %v437_v21 = vadd.s32 %v436_v16, %v279_v12 }
  0x62   : > { %v434_v17 = vadd.s32 8, %v279_v12  ;;  %v288_v19 = vsub.s32 2, %v279_v12  ;;  %s765_s29 = sshll.u32 %s1246_s27, 4  ;;  %s766_s29 = int_to_ptr.vmem [resolvable:$true] %s765_s29 }
  0x63   : > { %v281_v18 = vrot.slane %v276_v14, %v280_v13  ;;  %v285_v20 = vrot.slane %v276_v14, %v284_v15  ;;  %vm439_vm1 = vcmp.lt.s32.totalorder %v437_v21, 24  ;;  %v725_v61 = vld [vmem:[#allocation8] sm:$0x1]  ;;  %v735_v63 = vld [vmem:[#allocation10] sm:$0x1]  ;;  %s1112_s21 = scalar_lea.vmem %s766_s29, 16  ;;  %p1119_p5 = scmp.lt.s32.totalorder %s766_s29, %s766_s29 }
  0x64   : > { %345 = vmatpush1.bf16.msra.mxu0 %v1046_v5  ;;  %388 = vmatpush1.bf16.msra.mxu1 %v1053_v10  ;;  %v438_v23 = vadd.s32 %v436_v16, %v434_v17  ;;  %v289_v26 = vrot.slane %v276_v14, %v288_v19  ;;  %p1113_p10 = scmp.ne.s32.totalorder %s766_s29, %s1112_s21  ;;  %s1118_s12 = scalar_lea.vmem %s766_s29, 32 }
  0x65   : > { %p1120_p8 = scmp.lt.s32.totalorder %s1118_s12, %s1112_s21 }
  0x66   : > { %vm440_vm2 = vcmp.lt.s32.totalorder %v438_v23, 24  ;;  %p1114_p1 = pnand %p1113_p10, %p990_p9 }
  0x67   : > { %877 = vmatmul.mubr.msk.bf16.vlgmr.msra.gmra.mrb[0].mxu0 %vm338_vm0, %v1047_v9  ;;  %878 = vmatmul.mubr.msk.bf16.vlgmr.msra.gmra.mrb[0].mxu1 %vm338_vm0, %v1047_v9  ;;  %vm954_vm3 = vmpackc.low %vm440_vm2, %vm439_vm1  ;;  %p1121_p12 = por %p1120_p8, %p1119_p5 }
  0x68   : > { %p1115_p4 = pneg %p1114_p1 }
  0x6a   : > { %p1122_p0 = pnand %p1121_p12, %p1115_p4 }
 0x13a   : > { %v376_v22 = vpop.f32.mrb[0].mxu0  ;;  %v419_v34 = vpop.f32.mrb[0].mxu1 }
 0x13b   : > { %v377_v24 = vadd.f32 %v376_v22, %v281_v18  ;;  %v378_v25 = vpop.f32.mrb[1].mxu0  ;;  %v420_v36 = vadd.f32 %v419_v34, %v289_v26  ;;  %v421_v37 = vpop.f32.mrb[1].mxu1 }
 0x13c   : > { %v379_v27 = vadd.f32 %v378_v25, %v285_v20  ;;  %v380_v28 = vpop.f32.mrb[2].mxu0  ;;  %v422_v40 = vpop.f32.mrb[2].mxu1 }
 0x13d   : > { %v426_v29 = vmax.f32 %v377_v24, 0.0  ;;  %v381_v30 = vadd.f32 %v380_v28, %v281_v18  ;;  %v382_v31 = vpop.f32.mrb[3].mxu0  ;;  %v428_v43 = vmax.f32 %v420_v36, 0.0  ;;  %v423_v44 = vadd.f32 %v422_v40, %v289_v26  ;;  %v424_v45 = vpop.f32.mrb[3].mxu1 }
 0x13e   : > { %v427_v32 = vmax.f32 %v379_v27, 0.0  ;;  %v383_v33 = vadd.f32 %v382_v31, %v285_v20 }
 0x13f   : > { %v429_v35 = vmax.f32 %v381_v30, 0.0  ;;  %v445_v41 = vsel %vm439_vm1, %v426_v29, 0.0  ;;  %v431_v49 = vmax.f32 %v423_v44, 0.0 }
 0x140   : > { %v430_v38 = vmax.f32 %v383_v33, 0.0  ;;  %v446_v39 = vsel %vm439_vm1, %v427_v32, 0.0 }
 0x141   : > { %467 = vxpose.xlu0.b32.start [1/2] (short) %v446_v39, 128  ;;  %v448_v42 = vsel %vm440_vm2, %v429_v35, 0.0  ;;  %v953_v52 = vpack.c.bf16 %v431_v49, %v428_v43 }
 0x142   : > { %v449_v46 = vsel %vm440_vm2, %v430_v38, 0.0  ;;  %v726_v47 = vadd.f32 %v448_v42, %v445_v41 }
 0x143   : > { %v736_v48 = vadd.f32 %v449_v46, %v446_v39  ;;  %955 = vmatprep.subr.msk.bf16.mxu0 %vm954_vm3, %v953_v52  ;;  %959 = vmatprep.subr.msk.bf16.mxu1 %vm954_vm3, %v953_v52 }
 0x144   : > { %v727_v50 = vrot.slane %v726_v47, 4  ;;  %958 = vmatpush3.bf16.msk.msra.mxu0 %vm954_vm3, %v953_v52  ;;  %960 = vmatpush3.bf16.msk.msra.mxu1 %vm954_vm3, %v953_v52 }
 0x145   : > { %468 = vxpose.xlu0.b32.end [2/2] (short) %v449_v46, 128  ;;  %v737_v51 = vrot.slane %v736_v48, 4 }
 0x146   : > { %v728_v53 = vadd.f32 %v727_v50, %v726_v47 }
 0x147   : > { %v738_v54 = vadd.f32 %v737_v51, %v736_v48 }
 0x148   : > { %v729_v55 = vrot.slane %v728_v53, 2 }
 0x149   : > { %v739_v56 = vrot.slane %v738_v54, 2 }
 0x14a   : > { %v730_v57 = vadd.f32 %v729_v55, %v728_v53 }
 0x14b   : > { %v740_v58 = vadd.f32 %v739_v56, %v738_v54 }
 0x14c   : > { %v731_v59 = vrot.slane %v730_v57, 1 }
 0x14d   : > { %v741_v60 = vrot.slane %v740_v58, 1 }
 0x14e   : > { %v732_v62 = vadd.f32 %v731_v59, %v730_v57 }
 0x14f   : > { %v742_v0 = vadd.f32 %v741_v60, %v740_v58 }
 0x150   : > { %v733_v1 = vadd.f32 %v732_v62, %v725_v61 }
 0x151   : > { %v743_v2 = vadd.f32 %v742_v0, %v735_v63 }
 0x152   : > { %734 = vst [vmem:[#allocation8] sm:$0x1] %v733_v1 }
 0x153   : > { %744 = vst [vmem:[#allocation10] sm:$0x1] %v743_v2 }
 0x1c1   : > { %v483_v3 = vpop.trf.xlu0 }
 0x1c2   : > { %929 = vmatprep.mubr.msk.f32.mxu0 %vm499_vm4, %v483_v3 }
 0x1c5   : > { %v484_v4 = vpop.trf.xlu0 }
 0x1c6   : > { %930 = vmatmul.mubr.msk.f32.vlgmr.msra.gmra.mrb[4].mxu0 %vm499_vm4, %v484_v4 }
 0x1c9   : > { %v485_v5 = vpop.trf.xlu0 }
 0x1ca   : > { %932 = vmatprep.mubr.msk.f32.mxu0 %vm499_vm4, %v485_v5 }
 0x1cd   : > { %v486_v6 = vpop.trf.xlu0 }
 0x1ce   : > { %933 = vmatmul.mubr.msk.f32.gmra.mrb[6].mxu0 %vm499_vm4, %v486_v6 }
 0x1d1   : > { %v487_v7 = vpop.trf.xlu0 }
 0x1d2   : > { %935 = vmatprep.mubr.msk.f32.mxu0 %vm499_vm4, %v487_v7 }
 0x1d5   : > { %v488_v8 = vpop.trf.xlu0 }
 0x1d6   : > { %936 = vmatmul.mubr.msk.f32.gmra.mrb[8].mxu0 %vm499_vm4, %v488_v8 }
 0x1d9   : > { %v489_v9 = vpop.trf.xlu0 }
 0x1da   : > { %938 = vmatprep.mubr.msk.f32.mxu0 %vm499_vm4, %v489_v9 }
 0x1dd   : > { %v490_v10 = vpop.trf.xlu0 }
 0x1de   : > { %939 = vmatmul.mubr.msk.f32.gmra.mrb[10].mxu0 %vm499_vm4, %v490_v10 }
 0x1e1   : > { %v491_v11 = vpop.trf.xlu0 }
 0x1e2   : > { %941 = vmatprep.mubr.msk.f32.mxu1 %vm499_vm4, %v491_v11 }
 0x1e5   : > { %v492_v12 = vpop.trf.xlu0 }
 0x1e6   : > { %942 = vmatmul.mubr.msk.f32.vlgmr.msra.gmra.mrb[4].mxu1 %vm499_vm4, %v492_v12 }
 0x1e9   : > { %v493_v13 = vpop.trf.xlu0 }
 0x1ea   : > { %944 = vmatprep.mubr.msk.f32.mxu1 %vm499_vm4, %v493_v13 }
 0x1ed   : > { %v494_v14 = vpop.trf.xlu0 }
 0x1ee   : > { %945 = vmatmul.mubr.msk.f32.gmra.mrb[6].mxu1 %vm499_vm4, %v494_v14 }
 0x1f1   : > { %v495_v15 = vpop.trf.xlu0 }
 0x1f2   : > { %947 = vmatprep.mubr.msk.f32.mxu1 %vm499_vm4, %v495_v15 }
 0x1f5   : > { %v496_v16 = vpop.trf.xlu0 }
 0x1f6   : > { %948 = vmatmul.mubr.msk.f32.gmra.mrb[8].mxu1 %vm499_vm4, %v496_v16 }
 0x1f9   : > { %v497_v17 = vpop.trf.xlu0 }
 0x1fa   : > { %950 = vmatprep.mubr.msk.f32.mxu1 %vm499_vm4, %v497_v17 }
 0x1fd   : > { %v498_v18 = vpop.trf.xlu0 }
 0x1fe   : > { %951 = vmatmul.mubr.msk.f32.gmra.mrb[10].mxu1 %vm499_vm4, %v498_v18 }
 0x1ff   : > { %1125 = shalt.err (!%p1122_p0)
}
 0x200   : > { %s1126_s15 = scalar_lea.hbm %s1519_s4, 16 }
 0x201   : > { %p1127_p2 = scmp.ne.s32.totalorder %s1519_s4, %s1126_s15  ;;  %p1132_p3 = scmp.lt.u32.totalorder %s1126_s15, %s1519_s4 }
 0x203   : > { %p1128_p11 = pnand %p1127_p2, %p990_p9 }
 0x205   : > { %p1129_p13 = pneg %p1128_p11 }
 0x207   : > { %p1134_p6 = pnand %p1132_p3, %p1129_p13 }
 0x209   : > { %1137 = shalt.err (!%p1134_p6)
}
 0x20a   : > { %970 = dma.vmem_to_hbm [thread:$0]  (%p990_p9), %s766_s29, 16, %s1519_s4, [#allocation9]  }
 0x20b   : > { %s1247_s9 = smov [#allocation10]  }
 0x20c   : > { %s776_s26 = sshll.u32 %s1247_s9, 4  ;;  %s777_s26 = int_to_ptr.vmem [resolvable:$true] %s776_s26 }
 0x20d   : > { %s1138_s30 = scalar_lea.vmem %s777_s26, 16  ;;  %s1144_s11 = scalar_lea.vmem %s777_s26, 32 }
 0x20e   : > { %p1139_p7 = scmp.ne.s32.totalorder %s777_s26, %s1138_s30  ;;  %p1145_p4 = scmp.lt.s32.totalorder %s777_s26, %s777_s26 }
 0x20f   : > { %p1146_p5 = scmp.lt.s32.totalorder %s1144_s11, %s1138_s30 }
 0x210   : > { %p1140_p10 = pnand %p1139_p7, %p990_p9 }
 0x211   : > { %p1147_p8 = por %p1146_p5, %p1145_p4 }
 0x212   : > { %p1141_p1 = pneg %p1140_p10 }
 0x214   : > { %p1148_p12 = pnand %p1147_p8, %p1141_p1 }
 0x216   : > { %1151 = shalt.err (!%p1148_p12)
}
 0x217   : > { %s1152_s10 = scalar_lea.hbm %s1520_s5, 16 }
 0x218   : > { %p1153_p0 = scmp.ne.s32.totalorder %s1520_s5, %s1152_s10  ;;  %p1158_p13 = scmp.lt.u32.totalorder %s1152_s10, %s1520_s5 }
 0x21a   : > { %p1154_p2 = pnand %p1153_p0, %p990_p9 }
 0x21c   : > { %p1155_p11 = pneg %p1154_p2 }
 0x21e   : > { %p1160_p3 = pnand %p1158_p13, %p1155_p11 }
 0x220   : > { %1163 = shalt.err (!%p1160_p3)
}
 0x221   : > { %972 = dma.vmem_to_hbm [thread:$0]  (%p990_p9), %s777_s26, 16, %s1520_s5, [#allocation9]   ;;  %v452_v19 = vld [vmem:[#allocation7 + $0x8] sm:$0xff]  ;;  %v451_v20 = vld [vmem:[#allocation7] sm:$0xff]  ;;  %v454_v25 = vld [vmem:[#allocation7 + $0x18] sm:$0xff] }
 0x222   : > { %v453_v26 = vld [vmem:[#allocation7 + $0x10] sm:$0xff]  ;;  %v456_v31 = vld [vmem:[#allocation7 + $0x28] sm:$0xff]  ;;  %v455_v32 = vld [vmem:[#allocation7 + $0x20] sm:$0xff]  ;;  %s1248_s15 = smov [#allocation7]  }
 0x223   : > { %v458_v37 = vld [vmem:[#allocation7 + $0x38] sm:$0xff]  ;;  %v457_v38 = vld [vmem:[#allocation7 + $0x30] sm:$0xff]  ;;  %v460_v43 = vld [vmem:[#allocation7 + $0x48] sm:$0xff]  ;;  %s751_s16 = sshll.u32 %s1248_s15, 4  ;;  %s752_s16 = int_to_ptr.vmem [resolvable:$true] %s751_s16 }
 0x224   : > { %v459_v44 = vld [vmem:[#allocation7 + $0x40] sm:$0xff]  ;;  %v462_v49 = vld [vmem:[#allocation7 + $0x58] sm:$0xff]  ;;  %v461_v50 = vld [vmem:[#allocation7 + $0x50] sm:$0xff]  ;;  %s1164_s17 = scalar_lea.vmem %s752_s16, 2048  ;;  %p1171_p1 = scmp.lt.s32.totalorder %s752_s16, %s752_s16 }
 0x225   : > { %v464_v55 = vld [vmem:[#allocation7 + $0x68] sm:$0xff]  ;;  %v463_v56 = vld [vmem:[#allocation7 + $0x60] sm:$0xff]  ;;  %v466_v61 = vld [vmem:[#allocation7 + $0x78] sm:$0xff]  ;;  %p1165_p6 = scmp.ne.s32.totalorder %s752_s16, %s1164_s17  ;;  %p1172_p4 = scmp.lt.s32.totalorder %s1164_s17, %s1164_s17 }
 0x226   : > { %v465_v62 = vld [vmem:[#allocation7 + $0x70] sm:$0xff] }
 0x227   : > { %p1166_p7 = pnand %p1165_p6, %p990_p9  ;;  %p1173_p5 = por %p1172_p4, %p1171_p1 }
 0x229   : > { %p1167_p10 = pneg %p1166_p7 }
 0x22b   : > { %p1174_p8 = pnand %p1173_p5, %p1167_p10 }
 0x299   : > { %v931_v21 = vpop.f32.mrb[4].mxu0 }
 0x29a   : > { %v694_v22 = vadd.f32 %v931_v21, %v452_v19  ;;  %v614_v23 = vpop.f32.mrb[5].mxu0 }
 0x29b   : > { %v693_v24 = vadd.f32 %v614_v23, %v451_v20 }
 0x29c   : > { %710 = vst [vmem:[#allocation7 + $0x8] sm:$0xff] %v694_v22 }
 0x29d   : > { %709 = vst [vmem:[#allocation7] sm:$0xff] %v693_v24 }
 0x2a1   : > { %v934_v27 = vpop.f32.mrb[6].mxu0 }
 0x2a2   : > { %v696_v28 = vadd.f32 %v934_v27, %v454_v25  ;;  %v624_v29 = vpop.f32.mrb[7].mxu0 }
 0x2a3   : > { %v695_v30 = vadd.f32 %v624_v29, %v453_v26 }
 0x2a4   : > { %712 = vst [vmem:[#allocation7 + $0x18] sm:$0xff] %v696_v28 }
 0x2a5   : > { %711 = vst [vmem:[#allocation7 + $0x10] sm:$0xff] %v695_v30 }
 0x2a9   : > { %v937_v33 = vpop.f32.mrb[8].mxu0 }
 0x2aa   : > { %v698_v34 = vadd.f32 %v937_v33, %v456_v31  ;;  %v634_v35 = vpop.f32.mrb[9].mxu0 }
 0x2ab   : > { %v697_v36 = vadd.f32 %v634_v35, %v455_v32 }
 0x2ac   : > { %714 = vst [vmem:[#allocation7 + $0x28] sm:$0xff] %v698_v34 }
 0x2ad   : > { %713 = vst [vmem:[#allocation7 + $0x20] sm:$0xff] %v697_v36 }
 0x2b1   : > { %v940_v39 = vpop.f32.mrb[10].mxu0 }
 0x2b2   : > { %v700_v40 = vadd.f32 %v940_v39, %v458_v37  ;;  %v644_v41 = vpop.f32.mrb[11].mxu0 }
 0x2b3   : > { %v699_v42 = vadd.f32 %v644_v41, %v457_v38 }
 0x2b4   : > { %716 = vst [vmem:[#allocation7 + $0x38] sm:$0xff] %v700_v40 }
 0x2b5   : > { %715 = vst [vmem:[#allocation7 + $0x30] sm:$0xff] %v699_v42 }
 0x2b9   : > { %v943_v45 = vpop.f32.mrb[4].mxu1 }
 0x2ba   : > { %v702_v46 = vadd.f32 %v943_v45, %v460_v43  ;;  %v654_v47 = vpop.f32.mrb[5].mxu1 }
 0x2bb   : > { %v701_v48 = vadd.f32 %v654_v47, %v459_v44 }
 0x2bc   : > { %718 = vst [vmem:[#allocation7 + $0x48] sm:$0xff] %v702_v46 }
 0x2bd   : > { %717 = vst [vmem:[#allocation7 + $0x40] sm:$0xff] %v701_v48 }
 0x2c1   : > { %v946_v51 = vpop.f32.mrb[6].mxu1 }
 0x2c2   : > { %v704_v52 = vadd.f32 %v946_v51, %v462_v49  ;;  %v664_v53 = vpop.f32.mrb[7].mxu1 }
 0x2c3   : > { %v703_v54 = vadd.f32 %v664_v53, %v461_v50 }
 0x2c4   : > { %720 = vst [vmem:[#allocation7 + $0x58] sm:$0xff] %v704_v52 }
 0x2c5   : > { %719 = vst [vmem:[#allocation7 + $0x50] sm:$0xff] %v703_v54 }
 0x2c9   : > { %v949_v57 = vpop.f32.mrb[8].mxu1 }
 0x2ca   : > { %v706_v58 = vadd.f32 %v949_v57, %v464_v55  ;;  %v674_v59 = vpop.f32.mrb[9].mxu1 }
 0x2cb   : > { %v705_v60 = vadd.f32 %v674_v59, %v463_v56 }
 0x2cc   : > { %722 = vst [vmem:[#allocation7 + $0x68] sm:$0xff] %v706_v58 }
 0x2cd   : > { %721 = vst [vmem:[#allocation7 + $0x60] sm:$0xff] %v705_v60 }
 0x2d1   : > { %v952_v63 = vpop.f32.mrb[10].mxu1 }
 0x2d2   : > { %v708_v0 = vadd.f32 %v952_v63, %v466_v61  ;;  %v684_v1 = vpop.f32.mrb[11].mxu1 }
 0x2d3   : > { %v707_v2 = vadd.f32 %v684_v1, %v465_v62 }
 0x2d4   : > { %724 = vst [vmem:[#allocation7 + $0x78] sm:$0xff] %v708_v0 }
 0x2d5   : > { %723 = vst [vmem:[#allocation7 + $0x70] sm:$0xff] %v707_v2 }
 0x2d6   : > { %1177 = shalt.err (!%p1174_p8)
}
 0x2d7   : > { %s1178_s7 = scalar_lea.hbm %s1518_s3, 2048 }
 0x2d8   : > { %p1179_p12 = scmp.ne.s32.totalorder %s1518_s3, %s1178_s7  ;;  %p1184_p11 = scmp.lt.u32.totalorder %s1178_s7, %s1518_s3 }
 0x2da   : > { %p1180_p0 = pnand %p1179_p12, %p990_p9 }
 0x2dc   : > { %p1181_p2 = pneg %p1180_p0 }
 0x2de   : > { %p1186_p13 = pnand %p1184_p11, %p1181_p2 }
 0x2e0   : > { %1189 = shalt.err (!%p1186_p13)
}
 0x2e1   : > { %s1249_s11 = smov 128   ;;  %s1250_s23 = smov 8  }
 0x2e2   : > { %968 = dma.vmem_to_hbm [thread:$0]  (%p990_p9), %s752_s16, 2048, %s1518_s3, [#allocation4], %s1249_s11, %s1249_s11, %s1250_s23  }
 0x2e3   : > { %1215 = dma.done.wait (%p990_p9), [#allocation4], 2048  }
 0x2e4   : > { %1217 = vsyncadd (%p990_p9), [#allocation4], 4294965248 }
 0x2e5   : > { %1219 = dma.done.wait (%p990_p9), [#allocation9], 32  }
 0x2e6   : > { %1221 = vsyncadd (%p990_p9), [#allocation9], 4294967264 }
 0x2e7 PF: > { %s1533_s27 = smov %s1352_s18  ;;  %p19_p3 = scmp.ge.s32.totalorder %s1326_s28, 4  }
 0x2e8   : > { %s1534_s18 = smov %s1228_s19  ;;  %s1535_s19 = smov %s1232_s20 }
 0x2e9   : > { %s1536_s20 = smov %s1533_s27  ;;  %s1537_s21 = smov %s1326_s28 }
 0x2ea   :  { %21 = sbr.rel (!%p19_p3) target bundleno = 6 (0x6), region = 93 }
 0x2f1   :  { %797 = vsyncpa [#allocation3], 1 }
 0x2f2   :  { %799 = vsyncpa [#allocation3 + $0x1], 1 }
 0x2f3   :  { %800 = vsyncpa [#allocation6], 1 }
 0x2f4   :  { %801 = vsyncpa [#allocation4], 1 }
 0x2f5   :  { %803 = vsyncpa [#allocation4 + $0x1], 1 }
 0x2f6   :  { %804 = vsyncpa [#allocation9], 1 }

</bundles_post_ra>
